<compile_context>
chip_gen: v5e
topology: v5e:2x2
jax: 0.10.0
libtpu: 0.0.40
codegen_flags: <defaults>
</compile_context>

<pallas_src>
import jax
import jax.numpy as jnp
from jax import lax
from jax.experimental import pallas as pl
from jax.experimental.pallas import tpu as pltpu


def _transpose_kernel(x_ref, o_ref):
    # x_ref: (bh_tile, S_TILE, D) block in VMEM; o_ref: (bh_tile, D, S_TILE).
    bh_tile = x_ref.shape[0]

    def body(k, carry):
        # Clean per-slab 2-D (S_TILE, D) -> (D, S_TILE) XLU transpose; cheap
        # filler hidden under the HBM DMA of this bandwidth-bound kernel.
        o_ref[k] = x_ref[k].T
        return carry

    # Capped unroll: deep unroll buys nothing (DMA-bound) and can spill vregs.
    lax.fori_loop(0, bh_tile, body, 0, unroll=min(bh_tile, 8))


def _chip_tuning():
    """Per-generation (tile_budget_bytes, want_multi_tc, vmem_limit_bytes).

    v5e / v6e: single TensorCore, 128 MiB VMEM -> big blocks, no grid>=2 rule
               (splitting the grid only halves the block and doubles per-step
               overhead on a 1-TC chip).
    v7x (and unknown chips): 2 TCs sharing the chip, 64 MiB VMEM per TC ->
               conservative blocks and keep the grid >= 2 so both cores (each
               with its own HBM path) get work for this memory-bound op.
    """
    kind = ""
    try:
        kind = jax.devices()[0].device_kind.lower()
    except Exception:
        pass
    single_tc_big_vmem = ("v5" in kind or "v6" in kind) and "7" not in kind
    if single_tc_big_vmem:
        return 32 * 1024 * 1024, False, 64 * 1024 * 1024
    return 12 * 1024 * 1024, True, 48 * 1024 * 1024


def _pick_tiles(BH, S, D, dtype_bytes, budget_bytes, want_multi_tc):
    """Pick (bh_tile, s_tile).

    Constraints:
      * bh_tile divides BH; s_tile divides S and is a multiple of 128 (or == S),
        so both the input block (bh, s_tile, D) and the output block
        (bh, D, s_tile) satisfy the (8, 128) tiling rules and output stores stay
        unmasked lane-dense.
      * 4 * block_bytes (in + out, double-buffered) <= budget_bytes.
      * On 2-TC chips keep the total grid >= 2 whenever possible.
    Prefers the largest contiguous block (full-S slabs first).
    """
    s_cands = [S]
    if S % 128 == 0:
        s_cands += [t for t in range(128, S, 128) if S % t == 0]
    s_cands = sorted(set(s_cands), reverse=True)

    bh_divs = [d for d in range(BH, 0, -1) if BH % d == 0]

    def fits(bh_t, s_t):
        return 4 * bh_t * s_t * D * dtype_bytes <= budget_bytes

    best = None  # (block_bytes, bh_tile, s_tile)
    for s_t in s_cands:
        n_s = S // s_t
        for bh_t in bh_divs:
            n_blocks = (BH // bh_t) * n_s
            if want_multi_tc and BH * n_s >= 2 and n_blocks < 2:
                continue
            if not fits(bh_t, s_t):
                continue
            bb = bh_t * s_t * D * dtype_bytes
            if best is None or bb > best[0]:
                best = (bb, bh_t, s_t)
            break  # largest fitting bh_tile for this s_tile
    if best is None:
        # Nothing fits the budget: take the smallest legal tile and let the
        # raised vmem_limit decide at compile time.
        best = (0, 1, min(s_cands))
    return best[1], best[2]


def transpose_last_two(x):
    """Pallas equivalent of torch `x.transpose(-1, -2)` for a 4-D tensor."""
    B, H, S, D = x.shape
    BH = B * H
    x_flat = x.reshape(BH, S, D)

    dtype_bytes = jnp.dtype(x.dtype).itemsize
    budget, want_multi_tc, vmem_limit = _chip_tuning()
    bh_tile, s_tile = _pick_tiles(BH, S, D, dtype_bytes, budget, want_multi_tc)
    grid = (BH // bh_tile, S // s_tile)

    out_flat = pl.pallas_call(
        _transpose_kernel,
        out_shape=jax.ShapeDtypeStruct((BH, D, S), x.dtype),
        grid_spec=pltpu.PrefetchScalarGridSpec(
            num_scalar_prefetch=0,
            grid=grid,
            in_specs=[pl.BlockSpec((bh_tile, s_tile, D), lambda i, s: (i, s, 0))],
            out_specs=pl.BlockSpec((bh_tile, D, s_tile), lambda i, s: (i, 0, s)),
        ),
        compiler_params=pltpu.CompilerParams(
            dimension_semantics=("parallel", "parallel"),
            vmem_limit_bytes=vmem_limit,
        ),
        cost_estimate=pl.CostEstimate(
            flops=0,
            transcendentals=0,
            bytes_accessed=2 * BH * S * D * dtype_bytes,
        ),
    )(x_flat)

    return out_flat.reshape(B, H, D, S)


if __name__ == "__main__":
    key = jax.random.PRNGKey(0)

    # Small test shape (BH=8).
    B, H, S, D = 2, 4, 128, 64
    x = jax.random.normal(key, (B, H, S, D), dtype=jnp.float32)
    out = jax.block_until_ready(transpose_last_two(x))
    ref = jnp.transpose(x, (0, 1, 3, 2))
    assert out.shape == (B, H, D, S), out.shape
    assert jnp.array_equal(out, ref), "mismatch vs reference transpose (small shape)"

    # The module's stated attention-style shape [1, 12, 384, 64].
    x2 = jax.random.normal(jax.random.PRNGKey(1), (1, 12, 384, 64), dtype=jnp.float32)
    out2 = jax.block_until_ready(transpose_last_two(x2))
    ref2 = jnp.transpose(x2, (0, 1, 3, 2))
    assert out2.shape == (1, 12, 64, 384), out2.shape
    assert jnp.array_equal(out2, ref2), "mismatch vs reference transpose (module shape)"

    print("KERNEL_OK")
</pallas_src>

<mosaic_0001>
module attributes {stable_mosaic.version = 11 : i64} {
  func.func @_transpose_kernel(%arg0: i32, %arg1: i32, %arg2: memref<4x128x64xf32, #tpu.memory_space<vmem>>, %arg3: memref<4x64x128xf32, #tpu.memory_space<vmem>>) attributes {dimension_semantics = [#tpu.dimension_semantics<parallel>, #tpu.dimension_semantics<parallel>], iteration_bounds = array<i64: 2, 1>, scalar_prefetch = 0 : i64, scratch_operands = 0 : i64, tpu.core_type = #tpu.core_type<tc>, window_params = [{transform_indices = @transform_0, window_bounds = array<i64: 4, 128, 64>}, {transform_indices = @transform_1, window_bounds = array<i64: 4, 64, 128>}]} {
    %c0_i32 = arith.constant 0 : i32
    %0 = arith.index_cast %c0_i32 : i32 to index
    %c0 = arith.constant 0 : index
    %c0_0 = arith.constant 0 : index
    %1 = vector.load %arg2[%0, %c0, %c0_0] : memref<4x128x64xf32, #tpu.memory_space<vmem>>, vector<1x128x64xf32>
    %2 = vector.shape_cast %1 : vector<1x128x64xf32> to vector<128x64xf32>
    %3 = tpu.transpose %2, [1, 0] : vector<128x64xf32> -> vector<64x128xf32>
    %4 = arith.index_cast %c0_i32 : i32 to index
    %c0_1 = arith.constant 0 : index
    %c0_2 = arith.constant 0 : index
    %5 = vector.load %arg3[%4, %c0_1, %c0_2] : memref<4x64x128xf32, #tpu.memory_space<vmem>>, vector<1x64x128xf32>
    %6 = vector.shape_cast %5 : vector<1x64x128xf32> to vector<64x128xf32>
    %7 = vector.shape_cast %3 : vector<64x128xf32> to vector<1x64x128xf32>
    tpu.vector_store %arg3[%4, %c0_1, %c0_2], %7 {strides = array<i32>} : memref<4x64x128xf32, #tpu.memory_space<vmem>>, vector<1x64x128xf32>,
    %c1_i32 = arith.constant 1 : i32
    %8 = arith.index_cast %c1_i32 : i32 to index
    %c0_3 = arith.constant 0 : index
    %c0_4 = arith.constant 0 : index
    %9 = vector.load %arg2[%8, %c0_3, %c0_4] : memref<4x128x64xf32, #tpu.memory_space<vmem>>, vector<1x128x64xf32>
    %10 = vector.shape_cast %9 : vector<1x128x64xf32> to vector<128x64xf32>
    %11 = tpu.transpose %10, [1, 0] : vector<128x64xf32> -> vector<64x128xf32>
    %12 = arith.index_cast %c1_i32 : i32 to index
    %c0_5 = arith.constant 0 : index
    %c0_6 = arith.constant 0 : index
    %13 = vector.load %arg3[%12, %c0_5, %c0_6] : memref<4x64x128xf32, #tpu.memory_space<vmem>>, vector<1x64x128xf32>
    %14 = vector.shape_cast %13 : vector<1x64x128xf32> to vector<64x128xf32>
    %15 = vector.shape_cast %11 : vector<64x128xf32> to vector<1x64x128xf32>
    tpu.vector_store %arg3[%12, %c0_5, %c0_6], %15 {strides = array<i32>} : memref<4x64x128xf32, #tpu.memory_space<vmem>>, vector<1x64x128xf32>,
    %c2_i32 = arith.constant 2 : i32
    %16 = arith.index_cast %c2_i32 : i32 to index
    %c0_7 = arith.constant 0 : index
    %c0_8 = arith.constant 0 : index
    %17 = vector.load %arg2[%16, %c0_7, %c0_8] : memref<4x128x64xf32, #tpu.memory_space<vmem>>, vector<1x128x64xf32>
    %18 = vector.shape_cast %17 : vector<1x128x64xf32> to vector<128x64xf32>
    %19 = tpu.transpose %18, [1, 0] : vector<128x64xf32> -> vector<64x128xf32>
    %20 = arith.index_cast %c2_i32 : i32 to index
    %c0_9 = arith.constant 0 : index
    %c0_10 = arith.constant 0 : index
    %21 = vector.load %arg3[%20, %c0_9, %c0_10] : memref<4x64x128xf32, #tpu.memory_space<vmem>>, vector<1x64x128xf32>
    %22 = vector.shape_cast %21 : vector<1x64x128xf32> to vector<64x128xf32>
    %23 = vector.shape_cast %19 : vector<64x128xf32> to vector<1x64x128xf32>
    tpu.vector_store %arg3[%20, %c0_9, %c0_10], %23 {strides = array<i32>} : memref<4x64x128xf32, #tpu.memory_space<vmem>>, vector<1x64x128xf32>,
    %c3_i32 = arith.constant 3 : i32
    %24 = arith.index_cast %c3_i32 : i32 to index
    %c0_11 = arith.constant 0 : index
    %c0_12 = arith.constant 0 : index
    %25 = vector.load %arg2[%24, %c0_11, %c0_12] : memref<4x128x64xf32, #tpu.memory_space<vmem>>, vector<1x128x64xf32>
    %26 = vector.shape_cast %25 : vector<1x128x64xf32> to vector<128x64xf32>
    %27 = tpu.transpose %26, [1, 0] : vector<128x64xf32> -> vector<64x128xf32>
    %28 = arith.index_cast %c3_i32 : i32 to index
    %c0_13 = arith.constant 0 : index
    %c0_14 = arith.constant 0 : index
    %29 = vector.load %arg3[%28, %c0_13, %c0_14] : memref<4x64x128xf32, #tpu.memory_space<vmem>>, vector<1x64x128xf32>
    %30 = vector.shape_cast %29 : vector<1x64x128xf32> to vector<64x128xf32>
    %31 = vector.shape_cast %27 : vector<64x128xf32> to vector<1x64x128xf32>
    tpu.vector_store %arg3[%28, %c0_13, %c0_14], %31 {strides = array<i32>} : memref<4x64x128xf32, #tpu.memory_space<vmem>>, vector<1x64x128xf32>,
    %c4_i32 = arith.constant 4 : i32
    return
  }
  func.func @transform_0(%arg0: i32, %arg1: i32) -> (i32, i32, i32) {
    %c0_i32 = arith.constant 0 : i32
    %c0_i32_0 = arith.constant 0 : i32
    return %arg0, %arg1, %c0_i32 : i32, i32, i32
  }
  func.func @transform_1(%arg0: i32, %arg1: i32) -> (i32, i32, i32) {
    %c0_i32 = arith.constant 0 : i32
    %c0_i32_0 = arith.constant 0 : i32
    return %arg0, %c0_i32, %arg1 : i32, i32, i32
  }
}

</mosaic_0001>

<bundles_post_ra>
// kernel: tpu_custom_call.1
= control target key start
LH: loop header
LB: loop body
LE: loop exit
PB: predicated region body
PF: predicated region fallthrough
CT: control target
= control target key end

     0   :  { %6 = vsyncpa [#allocation3], 0  ;;  %s917_s0 = inlined_call_operand.vmem [shape: f32[8,128,64], index: 0, kind: input, shape index: {}]   ;;  %s918_s1 = inlined_call_operand.hbm [shape: f32[8,64,128], index: 1, kind: output, shape index: {}]  }
   0x1   :  { %8 = vsyncpa [#allocation3 + $0x1], 0  ;;  %s716_s6 = smov 0   ;;  %s718_s7 = smov 0  }
   0x2   :  { %s720_s8 = smov 0   ;;  %s722_s9 = smov 0  }
   0x3   :  { %s724_s10 = smov 0   ;;  %s726_s11 = smov 0  }
   0x4 LB: > { %s477_s12 = sadd.s32 4294967295, %s702_s11   ;;  %s478_s13 = sadd.s32 4294967294, %s702_s11   ;;  %s702_s11 = sphi %s726_s11, %s14_s11   ;;  %s698_s10 = sphi %s724_s10, %s925_s10   ;;  %s694_s9 = sphi %s722_s9, %s924_s9   ;;  %s690_s8 = sphi %s720_s8, %s923_s8   ;;  %s686_s7 = sphi %s718_s7, %s922_s7   ;;  %s682_s6 = sphi %s716_s6, %s921_s6  }
   0x5   : > { %s26_s14 = sadd.s32 1, %s698_s10  ;;  %s63_s15 = sadd.s32 1, %s690_s8 }
   0x6   : > { %p28_p0 = scmp.ge.s32.totalorder %s26_s14, 2  ;;  %p73_p1 = scmp.ne.s32.totalorder %s690_s8, %s686_s7 }
   0x7   : > { %p74_p2 = scmp.eq.s32.totalorder %s477_s12, 1  ;;  %p79_p3 = scmp.ne.s32.totalorder %s686_s7, %s682_s6 }
   0x8   : > { %s927_s14 = smov (%p28_p0, %s26_s14), 0  ;;  %p80_p5 = scmp.eq.s32.totalorder %s478_s13, 1 }
   0x9   : > { %p756_p4 = por %p74_p2, %p73_p1  ;;  %s58_s17 = ssub.s32 %s698_s10, %s927_s14 }
   0xa   : > { %p481_p6 = scmp.ge.s32.totalorder %s702_s11, 1  ;;  %p61_p7 = scmp.eq.s32.totalorder %s58_s17, 0 }
   0xb   : > { %p763_p8 = por %p80_p5, %p79_p3  ;;  %p113_p9 = scmp.lt.s32.totalorder %s702_s11, 3 }
   0xc   : > { %s769_s19 = scalar_select %p61_p7, %s690_s8, %s63_s15  }
   0xd   : > { %p114_p10 = pnand %p481_p6, %p113_p9 }
   0xe   : > { %s483_s20 = sshll.u32 (!%p114_p10), %s694_s9, 2  ;;  %s135_s25 = sand.u32 (!%p114_p10), 1, %s686_s7  }
   0xf   : > { %117 = sbr.rel (%p114_p10) target bundleno = 377 (0x179), region = 24  ;;  %p140_p11 = scmp.lt.s32.totalorder (!%p114_p10), %s483_s20, 7 }
  0x10   : > { %s482_s26 = sshll.u32 (!%p114_p10), %s135_s25, 8  ;;  %s566_s28 = sshll.u32 (!%p114_p10), %s694_s9, 8 }
  0x11   : > { %s831_s27 = scalar_lea.vmem (!%p114_p10), [#allocation2], %s482_s26  ;;  %s395_s2 = scalar_lea.hbm (!%p114_p10), %s918_s1, %s566_s28 }
  0x12   : > { %s396_s3 = sshll.u32 (!%p114_p10), %s831_s27, 4  ;;  %s398_s4 = sshll.u32 (!%p114_p10), %s395_s2, 4  ;;  %s397_s3 = int_to_ptr.vmem [resolvable:$true] %s396_s3  ;;  %s399_s4 = int_to_ptr.hbm [resolvable:$true] %s398_s4 }
  0x13   : > { %s382_s5 = scalar_lea.sflag (!%p114_p10), [#allocation3], %s135_s25  ;;  %s638_s12 = sshra.s32 (!%p114_p10), %s399_s4, 4  ;;  %s639_s12 = int_to_ptr.hbm [resolvable:$true] %s638_s12 }
  0x14   : > { %s929_s20 = smov (!%p140_p11, %s483_s20), 7  ;;  %s640_s13 = scalar_lea.hbm %s639_s12, 256 }
  0x15   : > { %s564_s21 = sshll.u32 %s929_s20, 7  ;;  %p641_p12 = scmp.ne.s32.totalorder %s639_s12, %s640_s13 }
  0x16   : > { %s775_s24 = scalar_lea.vmem %s917_s0, %s564_s21  ;;  %s644_s17 = scalar_lea.hbm %s918_s1, 512 }
  0x17   : > { %v151_v0 = vld [vmem:[%s775_s24] sm:$0xff]  ;;  %v152_v1 = vld [vmem:[%s775_s24 + $0x8] sm:$0xff]  ;;  %v153_v2 = vld [vmem:[%s775_s24 + $0x10] sm:$0xff]  ;;  %p642_p13 = pnand %p641_p12, %p756_p4  ;;  %p645_p1 = scmp.lt.s32.totalorder %s639_s12, %s918_s1 }
  0x18   : > { %167 = vxpose.xlu0.b32.start [1/16] (narrow) %v151_v0, 64  ;;  %v154_v3 = vld [vmem:[%s775_s24 + $0x18] sm:$0xff]  ;;  %v155_v4 = vld [vmem:[%s775_s24 + $0x20] sm:$0xff]  ;;  %v156_v5 = vld [vmem:[%s775_s24 + $0x28] sm:$0xff]  ;;  %p646_p2 = scmp.lt.s32.totalorder %s644_s17, %s640_s13 }
  0x19   : > { %v157_v6 = vld [vmem:[%s775_s24 + $0x30] sm:$0xff]  ;;  %v158_v7 = vld [vmem:[%s775_s24 + $0x38] sm:$0xff]  ;;  %v159_v8 = vld [vmem:[%s775_s24 + $0x40] sm:$0xff]  ;;  %p643_p0 = pneg %p642_p13 }
  0x1a   : > { %v160_v9 = vld [vmem:[%s775_s24 + $0x48] sm:$0xff]  ;;  %v161_v10 = vld [vmem:[%s775_s24 + $0x50] sm:$0xff]  ;;  %v162_v11 = vld [vmem:[%s775_s24 + $0x58] sm:$0xff]  ;;  %p647_p3 = por %p646_p2, %p645_p1 }
  0x1b   : > { %v486_v12 = vld [vmem:[%s775_s24 + $0x80] sm:$0xff]  ;;  %v487_v14 = vld [vmem:[%s775_s24 + $0x88] sm:$0xff]  ;;  %v488_v17 = vld [vmem:[%s775_s24 + $0x90] sm:$0xff] }
  0x1c   : > { %224 = vxpose.xlu1.b32.start [1/16] (narrow) %v486_v12, 64  ;;  %v163_v13 = vld [vmem:[%s775_s24 + $0x60] sm:$0xff]  ;;  %v164_v15 = vld [vmem:[%s775_s24 + $0x68] sm:$0xff]  ;;  %v165_v18 = vld [vmem:[%s775_s24 + $0x70] sm:$0xff]  ;;  %p648_p5 = pnand %p647_p3, %p643_p0 }
  0x1d   : > { %v510_v16 = vld [vmem:[%s775_s24 + $0x100] sm:$0xff]  ;;  %v511_v19 = vld [vmem:[%s775_s24 + $0x108] sm:$0xff]  ;;  %v489_v20 = vld [vmem:[%s775_s24 + $0x98] sm:$0xff] }
  0x1e   : > { %282 = vxpose.xlu2.b32.start [1/16] (narrow) %v510_v16, 64  ;;  %v166_v21 = vld [vmem:[%s775_s24 + $0x78] sm:$0xff]  ;;  %v512_v22 = vld [vmem:[%s775_s24 + $0x110] sm:$0xff]  ;;  %v490_v23 = vld [vmem:[%s775_s24 + $0xa0] sm:$0xff] }
  0x1f   : > { %v534_v24 = vld [vmem:[%s775_s24 + $0x180] sm:$0xff]  ;;  %v513_v25 = vld [vmem:[%s775_s24 + $0x118] sm:$0xff]  ;;  %v491_v26 = vld [vmem:[%s775_s24 + $0xa8] sm:$0xff] }
  0x20   : > { %168 = vxpose.xlu0.b32.cont [2/16] (narrow) %v152_v1, 64  ;;  %v535_v27 = vld [vmem:[%s775_s24 + $0x188] sm:$0xff]  ;;  %v514_v28 = vld [vmem:[%s775_s24 + $0x120] sm:$0xff]  ;;  %v492_v29 = vld [vmem:[%s775_s24 + $0xb0] sm:$0xff] }
  0x21   : > { %v536_v30 = vld [vmem:[%s775_s24 + $0x190] sm:$0xff]  ;;  %v515_v31 = vld [vmem:[%s775_s24 + $0x128] sm:$0xff]  ;;  %v493_v32 = vld [vmem:[%s775_s24 + $0xb8] sm:$0xff] }
  0x22   : > { %v537_v33 = vld [vmem:[%s775_s24 + $0x198] sm:$0xff]  ;;  %v516_v34 = vld [vmem:[%s775_s24 + $0x130] sm:$0xff]  ;;  %v494_v35 = vld [vmem:[%s775_s24 + $0xc0] sm:$0xff] }
  0x23   : > { %v538_v36 = vld [vmem:[%s775_s24 + $0x1a0] sm:$0xff]  ;;  %v517_v37 = vld [vmem:[%s775_s24 + $0x138] sm:$0xff]  ;;  %v495_v38 = vld [vmem:[%s775_s24 + $0xc8] sm:$0xff] }
  0x24   : > { %225 = vxpose.xlu1.b32.cont [2/16] (narrow) %v487_v14, 64  ;;  %v539_v39 = vld [vmem:[%s775_s24 + $0x1a8] sm:$0xff]  ;;  %v518_v40 = vld [vmem:[%s775_s24 + $0x140] sm:$0xff]  ;;  %v496_v41 = vld [vmem:[%s775_s24 + $0xd0] sm:$0xff] }
  0x25   : > { %v540_v42 = vld [vmem:[%s775_s24 + $0x1b0] sm:$0xff]  ;;  %v519_v43 = vld [vmem:[%s775_s24 + $0x148] sm:$0xff]  ;;  %v497_v44 = vld [vmem:[%s775_s24 + $0xd8] sm:$0xff] }
  0x26   : > { %283 = vxpose.xlu2.b32.cont [2/16] (narrow) %v511_v19, 64  ;;  %v541_v45 = vld [vmem:[%s775_s24 + $0x1b8] sm:$0xff]  ;;  %v520_v46 = vld [vmem:[%s775_s24 + $0x150] sm:$0xff]  ;;  %v498_v47 = vld [vmem:[%s775_s24 + $0xe0] sm:$0xff] }
  0x27   : > { %v542_v48 = vld [vmem:[%s775_s24 + $0x1c0] sm:$0xff]  ;;  %v521_v49 = vld [vmem:[%s775_s24 + $0x158] sm:$0xff]  ;;  %v499_v51 = vld [vmem:[%s775_s24 + $0xe8] sm:$0xff] }
  0x28   : > { %169 = vxpose.xlu0.b32.cont [3/16] (narrow) %v153_v2, 64  ;;  %v543_v52 = vld [vmem:[%s775_s24 + $0x1c8] sm:$0xff]  ;;  %v522_v53 = vld [vmem:[%s775_s24 + $0x160] sm:$0xff]  ;;  %v500_v55 = vld [vmem:[%s775_s24 + $0xf0] sm:$0xff] }
  0x29   : > { %v544_v56 = vld [vmem:[%s775_s24 + $0x1d0] sm:$0xff]  ;;  %v523_v57 = vld [vmem:[%s775_s24 + $0x168] sm:$0xff]  ;;  %v501_v59 = vld [vmem:[%s775_s24 + $0xf8] sm:$0xff] }
  0x2a   : > { %v545_v60 = vld [vmem:[%s775_s24 + $0x1d8] sm:$0xff]  ;;  %v524_v61 = vld [vmem:[%s775_s24 + $0x170] sm:$0xff]  ;;  %v546_v63 = vld [vmem:[%s775_s24 + $0x1e0] sm:$0xff] }
  0x2b   : > { %v525_v0 = vld [vmem:[%s775_s24 + $0x178] sm:$0xff]  ;;  %v547_v2 = vld [vmem:[%s775_s24 + $0x1e8] sm:$0xff] }
  0x2c   : > { %226 = vxpose.xlu1.b32.cont [3/16] (narrow) %v488_v17, 64 }
  0x2e   : > { %284 = vxpose.xlu2.b32.cont [3/16] (narrow) %v512_v22, 64 }
  0x30   : > { %170 = vxpose.xlu0.b32.cont [4/16] (narrow) %v154_v3, 64 }
  0x34   : > { %227 = vxpose.xlu1.b32.cont [4/16] (narrow) %v489_v20, 64 }
  0x36   : > { %285 = vxpose.xlu2.b32.cont [4/16] (narrow) %v513_v25, 64 }
  0x38   : > { %171 = vxpose.xlu0.b32.cont [5/16] (narrow) %v155_v4, 64  ;;  %v548_v4 = vld [vmem:[%s775_s24 + $0x1f0] sm:$0xff] }
  0x3c   : > { %228 = vxpose.xlu1.b32.cont [5/16] (narrow) %v490_v23, 64 }
  0x3e   : > { %286 = vxpose.xlu2.b32.cont [5/16] (narrow) %v514_v28, 64 }
  0x40   : > { %172 = vxpose.xlu0.b32.cont [6/16] (narrow) %v156_v5, 64 }
  0x44   : > { %229 = vxpose.xlu1.b32.cont [6/16] (narrow) %v491_v26, 64 }
  0x46   : > { %287 = vxpose.xlu2.b32.cont [6/16] (narrow) %v515_v31, 64 }
  0x48   : > { %173 = vxpose.xlu0.b32.cont [7/16] (narrow) %v157_v6, 64  ;;  %v549_v6 = vld [vmem:[%s775_s24 + $0x1f8] sm:$0xff] }
  0x4c   : > { %230 = vxpose.xlu1.b32.cont [7/16] (narrow) %v492_v29, 64 }
  0x4e   : > { %288 = vxpose.xlu2.b32.cont [7/16] (narrow) %v516_v34, 64 }
  0x50   : > { %174 = vxpose.xlu0.b32.cont [8/16] (narrow) %v158_v7, 64 }
  0x54   : > { %231 = vxpose.xlu1.b32.cont [8/16] (narrow) %v493_v32, 64 }
  0x56   : > { %289 = vxpose.xlu2.b32.cont [8/16] (narrow) %v517_v37, 64 }
  0x58   : > { %175 = vxpose.xlu0.b32.cont [9/16] (narrow) %v159_v8, 64 }
  0x5c   : > { %232 = vxpose.xlu1.b32.cont [9/16] (narrow) %v494_v35, 64 }
  0x5e   : > { %290 = vxpose.xlu2.b32.cont [9/16] (narrow) %v518_v40, 64 }
  0x60   : > { %176 = vxpose.xlu0.b32.cont [10/16] (narrow) %v160_v9, 64 }
  0x64   : > { %233 = vxpose.xlu1.b32.cont [10/16] (narrow) %v495_v38, 64 }
  0x66   : > { %291 = vxpose.xlu2.b32.cont [10/16] (narrow) %v519_v43, 64 }
  0x68   : > { %177 = vxpose.xlu0.b32.cont [11/16] (narrow) %v161_v10, 64 }
  0x6c   : > { %234 = vxpose.xlu1.b32.cont [11/16] (narrow) %v496_v41, 64 }
  0x6e   : > { %292 = vxpose.xlu2.b32.cont [11/16] (narrow) %v520_v46, 64 }
  0x70   : > { %178 = vxpose.xlu0.b32.cont [12/16] (narrow) %v162_v11, 64 }
  0x74   : > { %235 = vxpose.xlu1.b32.cont [12/16] (narrow) %v497_v44, 64 }
  0x76   : > { %293 = vxpose.xlu2.b32.cont [12/16] (narrow) %v521_v49, 64 }
  0x78   : > { %179 = vxpose.xlu0.b32.cont [13/16] (narrow) %v163_v13, 64 }
  0x7c   : > { %236 = vxpose.xlu1.b32.cont [13/16] (narrow) %v498_v47, 64 }
  0x7e   : > { %294 = vxpose.xlu2.b32.cont [13/16] (narrow) %v522_v53, 64 }
  0x80   : > { %180 = vxpose.xlu0.b32.cont [14/16] (narrow) %v164_v15, 64 }
  0x84   : > { %237 = vxpose.xlu1.b32.cont [14/16] (narrow) %v499_v51, 64 }
  0x86   : > { %295 = vxpose.xlu2.b32.cont [14/16] (narrow) %v523_v57, 64 }
  0x88   : > { %181 = vxpose.xlu0.b32.cont [15/16] (narrow) %v165_v18, 64 }
  0x8c   : > { %238 = vxpose.xlu1.b32.cont [15/16] (narrow) %v500_v55, 64 }
  0x8e   : > { %296 = vxpose.xlu2.b32.cont [15/16] (narrow) %v524_v61, 64 }
  0x90   : > { %182 = vxpose.xlu0.b32.end [16/16] (narrow) %v166_v21, 64 }
  0x94   : > { %239 = vxpose.xlu1.b32.end [16/16] (narrow) %v501_v59, 64 }
  0x96   : > { %297 = vxpose.xlu2.b32.end [16/16] (narrow) %v525_v0, 64 }
  0x98   : > { %340 = vxpose.xlu0.b32.start [1/16] (narrow) %v534_v24, 64 }
  0xa0   : > { %341 = vxpose.xlu0.b32.cont [2/16] (narrow) %v535_v27, 64 }
  0xa8   : > { %342 = vxpose.xlu0.b32.cont [3/16] (narrow) %v536_v30, 64 }
  0xb0   : > { %343 = vxpose.xlu0.b32.cont [4/16] (narrow) %v537_v33, 64 }
  0xb7   : > { %v298_v9 = vpop.trf.xlu2 }
  0xb8   : > { %344 = vxpose.xlu0.b32.cont [5/16] (narrow) %v538_v36, 64  ;;  %526 = vst [vmem:[%s831_s27 + $0x80] sm:$0xff] %v298_v9 }
  0xbc   : > { %v183_v50 = vpop.trf.xlu0 }
  0xbd   : > { %199 = vst [vmem:[%s831_s27] sm:$0xff] %v183_v50 }
  0xbf   : > { %v299_v11 = vpop.trf.xlu2 }
  0xc0   : > { %345 = vxpose.xlu0.b32.cont [6/16] (narrow) %v539_v39, 64  ;;  %v240_v8 = vpop.trf.xlu1  ;;  %527 = vst [vmem:[%s831_s27 + $0x88] sm:$0xff] %v299_v11 }
  0xc1   : > { %502 = vst [vmem:[%s831_s27 + $0x40] sm:$0xff] %v240_v8 }
  0xc4   : > { %v184_v54 = vpop.trf.xlu0 }
  0xc5   : > { %200 = vst [vmem:[%s831_s27 + $0x8] sm:$0xff] %v184_v54 }
  0xc7   : > { %v300_v13 = vpop.trf.xlu2 }
  0xc8   : > { %346 = vxpose.xlu0.b32.cont [7/16] (narrow) %v540_v42, 64  ;;  %v241_v10 = vpop.trf.xlu1  ;;  %528 = vst [vmem:[%s831_s27 + $0x90] sm:$0xff] %v300_v13 }
  0xc9   : > { %503 = vst [vmem:[%s831_s27 + $0x48] sm:$0xff] %v241_v10 }
  0xcc   : > { %v185_v58 = vpop.trf.xlu0 }
  0xcd   : > { %201 = vst [vmem:[%s831_s27 + $0x10] sm:$0xff] %v185_v58 }
  0xcf   : > { %v301_v15 = vpop.trf.xlu2 }
  0xd0   : > { %347 = vxpose.xlu0.b32.cont [8/16] (narrow) %v541_v45, 64  ;;  %v242_v12 = vpop.trf.xlu1  ;;  %529 = vst [vmem:[%s831_s27 + $0x98] sm:$0xff] %v301_v15 }
  0xd1   : > { %504 = vst [vmem:[%s831_s27 + $0x50] sm:$0xff] %v242_v12 }
  0xd4   : > { %v186_v62 = vpop.trf.xlu0 }
  0xd5   : > { %202 = vst [vmem:[%s831_s27 + $0x18] sm:$0xff] %v186_v62 }
  0xd7   : > { %v302_v17 = vpop.trf.xlu2 }
  0xd8   : > { %348 = vxpose.xlu0.b32.cont [9/16] (narrow) %v542_v48, 64  ;;  %v243_v14 = vpop.trf.xlu1  ;;  %530 = vst [vmem:[%s831_s27 + $0xa0] sm:$0xff] %v302_v17 }
  0xd9   : > { %505 = vst [vmem:[%s831_s27 + $0x58] sm:$0xff] %v243_v14 }
  0xdc   : > { %v187_v1 = vpop.trf.xlu0 }
  0xdd   : > { %203 = vst [vmem:[%s831_s27 + $0x20] sm:$0xff] %v187_v1 }
  0xdf   : > { %v303_v20 = vpop.trf.xlu2 }
  0xe0   : > { %349 = vxpose.xlu0.b32.cont [10/16] (narrow) %v543_v52, 64  ;;  %v244_v16 = vpop.trf.xlu1  ;;  %531 = vst [vmem:[%s831_s27 + $0xa8] sm:$0xff] %v303_v20 }
  0xe1   : > { %506 = vst [vmem:[%s831_s27 + $0x60] sm:$0xff] %v244_v16 }
  0xe4   : > { %v188_v3 = vpop.trf.xlu0 }
  0xe5   : > { %204 = vst [vmem:[%s831_s27 + $0x28] sm:$0xff] %v188_v3 }
  0xe7   : > { %v304_v23 = vpop.trf.xlu2 }
  0xe8   : > { %350 = vxpose.xlu0.b32.cont [11/16] (narrow) %v544_v56, 64  ;;  %v245_v19 = vpop.trf.xlu1  ;;  %532 = vst [vmem:[%s831_s27 + $0xb0] sm:$0xff] %v304_v23 }
  0xe9   : > { %507 = vst [vmem:[%s831_s27 + $0x68] sm:$0xff] %v245_v19 }
  0xec   : > { %v189_v5 = vpop.trf.xlu0 }
  0xed   : > { %205 = vst [vmem:[%s831_s27 + $0x30] sm:$0xff] %v189_v5 }
  0xef   : > { %v305_v26 = vpop.trf.xlu2 }
  0xf0   : > { %351 = vxpose.xlu0.b32.cont [12/16] (narrow) %v545_v60, 64  ;;  %v246_v22 = vpop.trf.xlu1  ;;  %533 = vst [vmem:[%s831_s27 + $0xb8] sm:$0xff] %v305_v26 }
  0xf1   : > { %508 = vst [vmem:[%s831_s27 + $0x70] sm:$0xff] %v246_v22 }
  0xf4   : > { %v190_v7 = vpop.trf.xlu0 }
  0xf5   : > { %206 = vst [vmem:[%s831_s27 + $0x38] sm:$0xff] %v190_v7 }
  0xf8   : > { %352 = vxpose.xlu0.b32.cont [13/16] (narrow) %v546_v63, 64  ;;  %v247_v25 = vpop.trf.xlu1 }
  0xf9   : > { %509 = vst [vmem:[%s831_s27 + $0x78] sm:$0xff] %v247_v25 }
 0x100   : > { %353 = vxpose.xlu0.b32.cont [14/16] (narrow) %v547_v2, 64 }
 0x108   : > { %354 = vxpose.xlu0.b32.cont [15/16] (narrow) %v548_v4, 64 }
 0x110   : > { %355 = vxpose.xlu0.b32.end [16/16] (narrow) %v549_v6, 64 }
 0x13c   : > { %v356_v18 = vpop.trf.xlu0 }
 0x13d   : > { %550 = vst [vmem:[%s831_s27 + $0xc0] sm:$0xff] %v356_v18 }
 0x144   : > { %v357_v21 = vpop.trf.xlu0 }
 0x145   : > { %551 = vst [vmem:[%s831_s27 + $0xc8] sm:$0xff] %v357_v21 }
 0x14c   : > { %v358_v24 = vpop.trf.xlu0 }
 0x14d   : > { %552 = vst [vmem:[%s831_s27 + $0xd0] sm:$0xff] %v358_v24 }
 0x154   : > { %v359_v27 = vpop.trf.xlu0 }
 0x155   : > { %553 = vst [vmem:[%s831_s27 + $0xd8] sm:$0xff] %v359_v27 }
 0x15c   : > { %v360_v28 = vpop.trf.xlu0 }
 0x15d   : > { %554 = vst [vmem:[%s831_s27 + $0xe0] sm:$0xff] %v360_v28 }
 0x164   : > { %v361_v29 = vpop.trf.xlu0 }
 0x165   : > { %555 = vst [vmem:[%s831_s27 + $0xe8] sm:$0xff] %v361_v29 }
 0x16c   : > { %v362_v30 = vpop.trf.xlu0 }
 0x16d   : > { %556 = vst [vmem:[%s831_s27 + $0xf0] sm:$0xff] %v362_v30 }
 0x174   : > { %v363_v31 = vpop.trf.xlu0 }
 0x175   : > { %557 = vst [vmem:[%s831_s27 + $0xf8] sm:$0xff] %v363_v31 }
 0x176   : > { %651 = shalt.err (!%p648_p5)
}
 0x177   : > { %s704_s22 = smov 128   ;;  %s705_s23 = smov 8  }
 0x178   : > { %567 = dma.vmem_to_hbm [thread:$0]  (%p756_p4), %s397_s3, 4096, %s399_s4, %s382_s5, %s704_s22, %s704_s22, %s705_s23  }
 0x179 PF: > { %p573_p6 = scmp.ge.s32.totalorder %s702_s11, 2  ;;  %s413_s24 = sand.u32 1, %s682_s6  }
 0x17a   : > { %s414_s25 = scalar_lea.sflag [#allocation3], %s413_s24 }
 0x17b   : > { %p570_p7 = pnand %p573_p6, %p763_p8 }
 0x17d   : > { %p571_p9 = pneg %p570_p7 }
 0x17f   : > { %677 = dma.done.wait (%p571_p9), %s414_s25, 4096  }
 0x180   : > { %679 = vsyncadd (%p571_p9), %s414_s25, 4294963200  ;;  %s14_s11 = sadd.s32 1, %s702_s11   ;;  %s921_s6 = smov %s686_s7 }
 0x181   : > { %p11_p10 = scmp.ge.s32.totalorder %s14_s11, 4   ;;  %s922_s7 = smov %s690_s8 }
 0x182   : > { %s923_s8 = smov %s769_s19  ;;  %s924_s9 = smov %s698_s10 }
 0x183   : > { %s925_s10 = smov %s927_s14  ;;  %13 = sbr.rel (!%p11_p10) target bundleno = 4 (0x4), region = 65 }
 0x188   :  { %420 = vsyncpa [#allocation3], 1 }
 0x189   :  { %422 = vsyncpa [#allocation3 + $0x1], 1 }

</bundles_post_ra>
